<compile_context>
chip_gen: v5e
topology: v5e:2x2
jax: 0.10.0
libtpu: 0.0.40
codegen_flags: <defaults>
</compile_context>

<pallas_src>
import jax
import jax.numpy as jnp
from jax.experimental import pallas as pl
from jax.experimental.pallas import tpu as pltpu


def _round_up(x, m):
    return ((x + m - 1) // m) * m


def policy_kernel(x_ref, w1_ref, b1_ref, w2_ref, b2_ref, w3_ref, b3_ref,
                  scale_ref, bias_ref, o_ref):
    """One batch tile of the fused actor MLP.

    h1 = relu(x  @ W1 + b1)          # [TB, 512]
    h2 = relu(h1 @ W2 + b2)          # [TB, 256]
    h3 = relu(h2 @ W3 + b3)          # [TB, A_pad]
    out = tanh(h3) * scale + bias    # [TB, A_pad]
    """
    bf16 = jnp.bfloat16

    x = x_ref[...].astype(bf16)
    h1 = jnp.dot(x, w1_ref[...].astype(bf16),
                 preferred_element_type=jnp.float32) + b1_ref[...]
    h1 = jnp.maximum(h1, 0.0)

    h2 = jnp.dot(h1.astype(bf16), w2_ref[...].astype(bf16),
                 preferred_element_type=jnp.float32) + b2_ref[...]
    h2 = jnp.maximum(h2, 0.0)

    h3 = jnp.dot(h2.astype(bf16), w3_ref[...].astype(bf16),
                 preferred_element_type=jnp.float32) + b3_ref[...]
    h3 = jnp.maximum(h3, 0.0)

    o_ref[...] = jnp.tanh(h3) * scale_ref[...] + bias_ref[...]


def policy_network_forward(x, params, *, tb=256):
    """Batch-tiled pallas_call.  Pads the batch to a multiple of the row tile TB
    and the action dim to a multiple of 128 lanes; weights stay VMEM-resident
    across grid steps via constant index_maps."""
    w1, b1, w2, b2, w3, b3, scale, bias = params
    B, D_in = x.shape
    H1 = w1.shape[1]
    H2 = w2.shape[1]
    A = w3.shape[1]

    # --- lane-dense action dimension (pad to 128) ---------------------------
    LANE = 128
    A_pad = _round_up(A, LANE)
    if A_pad != A:
        pad_c = ((0, 0), (0, A_pad - A))
        w3 = jnp.pad(w3, pad_c)
        b3 = jnp.pad(b3, pad_c)
        scale = jnp.pad(scale, pad_c)
        bias = jnp.pad(bias, pad_c)

    # --- batch tiling (>= 8 rows per tile; big tiles when batch allows) -----
    TB = min(tb, _round_up(B, 8))
    B_pad = _round_up(B, TB)
    if B_pad != B:
        x = jnp.pad(x, ((0, B_pad - B), (0, 0)))

    grid = (B_pad // TB,)
    const = lambda i: (0, 0)   # weights / biases: same block every grid step

    out = pl.pallas_call(
        policy_kernel,
        out_shape=jax.ShapeDtypeStruct((B_pad, A_pad), jnp.float32),
        grid=grid,
        in_specs=[
            pl.BlockSpec((TB, D_in), lambda i: (i, 0)),   # x: streamed per tile
            pl.BlockSpec((D_in, H1), const),              # W1
            pl.BlockSpec((1, H1), const),                 # b1
            pl.BlockSpec((H1, H2), const),                # W2
            pl.BlockSpec((1, H2), const),                 # b2
            pl.BlockSpec((H2, A_pad), const),             # W3 (padded)
            pl.BlockSpec((1, A_pad), const),              # b3 (padded)
            pl.BlockSpec((1, A_pad), const),              # scale (padded)
            pl.BlockSpec((1, A_pad), const),              # bias (padded)
        ],
        out_specs=pl.BlockSpec((TB, A_pad), lambda i: (i, 0)),
        compiler_params=pltpu.CompilerParams(
            dimension_semantics=("parallel",)),           # megacore split on v7x
    )(x, w1, b1, w2, b2, w3, b3, scale, bias)

    return out[:B, :A]


def init_params(key, d_in, A):
    """Deterministic parameter init (uniform fan-in, like torch.nn.Linear)."""
    ks = jax.random.split(key, 6)

    def linear(kw, kb, fan_in, fan_out):
        lim = 1.0 / jnp.sqrt(jnp.float32(fan_in))
        w = jax.random.uniform(kw, (fan_in, fan_out), jnp.float32, -lim, lim)
        b = jax.random.uniform(kb, (1, fan_out), jnp.float32, -lim, lim)
        return w, b

    w1, b1 = linear(ks[0], ks[1], d_in, 512)
    w2, b2 = linear(ks[2], ks[3], 512, 256)
    w3, b3 = linear(ks[4], ks[5], 256, A)
    # scale / bias stand in for the per-dimension action-range numpy arrays
    scale = (1.0 + 0.1 * jnp.arange(A, dtype=jnp.float32)).reshape(1, A)
    bias = (0.05 * jnp.arange(A, dtype=jnp.float32) + 0.5).reshape(1, A)
    return (w1, b1, w2, b2, w3, b3, scale, bias)


def reference_forward(x, params):
    """Pure-JAX reference mirroring the kernel's bf16-matmul / f32-accumulate path
    (same math as the PyTorch forward)."""
    w1, b1, w2, b2, w3, b3, scale, bias = params
    bf16 = jnp.bfloat16
    h = jnp.maximum(jnp.dot(x.astype(bf16), w1.astype(bf16),
                            preferred_element_type=jnp.float32) + b1, 0.0)
    h = jnp.maximum(jnp.dot(h.astype(bf16), w2.astype(bf16),
                            preferred_element_type=jnp.float32) + b2, 0.0)
    h = jnp.maximum(jnp.dot(h.astype(bf16), w3.astype(bf16),
                            preferred_element_type=jnp.float32) + b3, 0.0)
    return jnp.tanh(h) * scale + bias


if __name__ == "__main__":
    key = jax.random.PRNGKey(0)
    k_x, k_x2, k_p = jax.random.split(key, 3)

    B, D_IN, A = 2, 32, 8
    params = init_params(k_p, D_IN, A)

    # Small-batch case (B=2): single grid step, padded to 8 rows / 128 lanes.
    x = jax.random.normal(k_x, (B, D_IN), dtype=jnp.float32)
    out = jax.block_until_ready(policy_network_forward(x, params))
    ref = reference_forward(x, params)
    assert out.shape == (B, A)
    assert jnp.allclose(out, ref, atol=1e-2, rtol=1e-2), "mismatch vs reference (B=2)"

    # Multi-tile case: exercises the batch grid (grid=(4,)) with small tiles.
    B2 = 32
    x2 = jax.random.normal(k_x2, (B2, D_IN), dtype=jnp.float32)
    out2 = jax.block_until_ready(policy_network_forward(x2, params, tb=8))
    ref2 = reference_forward(x2, params)
    assert out2.shape == (B2, A)
    assert jnp.allclose(out2, ref2, atol=1e-2, rtol=1e-2), "mismatch vs reference (B=32)"

    print("KERNEL_OK")
</pallas_src>

<mosaic_0001>
module attributes {stable_mosaic.version = 11 : i64} {
  func.func @policy_kernel(%arg0: i32, %arg1: memref<8x32xf32, #tpu.memory_space<vmem>>, %arg2: memref<32x512xf32, #tpu.memory_space<vmem>>, %arg3: memref<1x512xf32, #tpu.memory_space<vmem>>, %arg4: memref<512x256xf32, #tpu.memory_space<vmem>>, %arg5: memref<1x256xf32, #tpu.memory_space<vmem>>, %arg6: memref<256x128xf32, #tpu.memory_space<vmem>>, %arg7: memref<1x128xf32, #tpu.memory_space<vmem>>, %arg8: memref<1x128xf32, #tpu.memory_space<vmem>>, %arg9: memref<1x128xf32, #tpu.memory_space<vmem>>, %arg10: memref<8x128xf32, #tpu.memory_space<vmem>>) attributes {dimension_semantics = [#tpu.dimension_semantics<parallel>], iteration_bounds = array<i64: 1>, scalar_prefetch = 0 : i64, scratch_operands = 0 : i64, tpu.core_type = #tpu.core_type<tc>, window_params = [{transform_indices = @transform_0, window_bounds = array<i64: 8, 32>}, {pipeline_mode = #tpu.pipeline_mode<synchronous>, transform_indices = @transform_1, window_bounds = array<i64: 32, 512>}, {pipeline_mode = #tpu.pipeline_mode<synchronous>, transform_indices = @transform_2, window_bounds = array<i64: 1, 512>}, {pipeline_mode = #tpu.pipeline_mode<synchronous>, transform_indices = @transform_3, window_bounds = array<i64: 512, 256>}, {pipeline_mode = #tpu.pipeline_mode<synchronous>, transform_indices = @transform_4, window_bounds = array<i64: 1, 256>}, {pipeline_mode = #tpu.pipeline_mode<synchronous>, transform_indices = @transform_5, window_bounds = array<i64: 256, 128>}, {pipeline_mode = #tpu.pipeline_mode<synchronous>, transform_indices = @transform_6, window_bounds = array<i64: 1, 128>}, {pipeline_mode = #tpu.pipeline_mode<synchronous>, transform_indices = @transform_7, window_bounds = array<i64: 1, 128>}, {pipeline_mode = #tpu.pipeline_mode<synchronous>, transform_indices = @transform_8, window_bounds = array<i64: 1, 128>}, {transform_indices = @transform_9, window_bounds = array<i64: 8, 128>}]} {
    %c0 = arith.constant 0 : index
    %c0_0 = arith.constant 0 : index
    %0 = vector.load %arg1[%c0, %c0_0] : memref<8x32xf32, #tpu.memory_space<vmem>>, vector<8x32xf32>
    %1 = arith.truncf %0 : vector<8x32xf32> to vector<8x32xbf16>
    %c0_1 = arith.constant 0 : index
    %c0_2 = arith.constant 0 : index
    %2 = vector.load %arg2[%c0_1, %c0_2] : memref<32x512xf32, #tpu.memory_space<vmem>>, vector<32x512xf32>
    %3 = arith.truncf %2 : vector<32x512xf32> to vector<32x512xbf16>
    %cst = arith.constant dense<0.000000e+00> : vector<8x512xf32>
    %4 = tpu.matmul %1, %3, %cst {dimension_numbers = #tpu.dot_dimension_numbers<[1], [0], [0], [1], [0, 0, 1, 1], [], []>} : vector<8x32xbf16>, vector<32x512xbf16>, vector<8x512xf32> -> vector<8x512xf32>
    %c0_3 = arith.constant 0 : index
    %c0_4 = arith.constant 0 : index
    %5 = vector.load %arg3[%c0_3, %c0_4] : memref<1x512xf32, #tpu.memory_space<vmem>>, vector<1x512xf32>
    %6 = vector.broadcast %5 : vector<1x512xf32> to vector<8x512xf32>
    %7 = arith.addf %4, %6 : vector<8x512xf32>
    %cst_5 = arith.constant 0.000000e+00 : f32
    %8 = vector.broadcast %cst_5 : f32 to vector<8x512xf32>
    %9 = arith.maximumf %7, %8 : vector<8x512xf32>
    %10 = arith.truncf %9 : vector<8x512xf32> to vector<8x512xbf16>
    %c0_6 = arith.constant 0 : index
    %c0_7 = arith.constant 0 : index
    %11 = vector.load %arg4[%c0_6, %c0_7] : memref<512x256xf32, #tpu.memory_space<vmem>>, vector<512x256xf32>
    %12 = arith.truncf %11 : vector<512x256xf32> to vector<512x256xbf16>
    %cst_8 = arith.constant dense<0.000000e+00> : vector<8x256xf32>
    %13 = tpu.matmul %10, %12, %cst_8 {dimension_numbers = #tpu.dot_dimension_numbers<[1], [0], [0], [1], [0, 0, 1, 1], [], []>} : vector<8x512xbf16>, vector<512x256xbf16>, vector<8x256xf32> -> vector<8x256xf32>
    %c0_9 = arith.constant 0 : index
    %c0_10 = arith.constant 0 : index
    %14 = vector.load %arg5[%c0_9, %c0_10] : memref<1x256xf32, #tpu.memory_space<vmem>>, vector<1x256xf32>
    %15 = vector.broadcast %14 : vector<1x256xf32> to vector<8x256xf32>
    %16 = arith.addf %13, %15 : vector<8x256xf32>
    %cst_11 = arith.constant 0.000000e+00 : f32
    %17 = vector.broadcast %cst_11 : f32 to vector<8x256xf32>
    %18 = arith.maximumf %16, %17 : vector<8x256xf32>
    %19 = arith.truncf %18 : vector<8x256xf32> to vector<8x256xbf16>
    %c0_12 = arith.constant 0 : index
    %c0_13 = arith.constant 0 : index
    %20 = vector.load %arg6[%c0_12, %c0_13] : memref<256x128xf32, #tpu.memory_space<vmem>>, vector<256x128xf32>
    %21 = arith.truncf %20 : vector<256x128xf32> to vector<256x128xbf16>
    %cst_14 = arith.constant dense<0.000000e+00> : vector<8x128xf32>
    %22 = tpu.matmul %19, %21, %cst_14 {dimension_numbers = #tpu.dot_dimension_numbers<[1], [0], [0], [1], [0, 0, 1, 1], [], []>} : vector<8x256xbf16>, vector<256x128xbf16>, vector<8x128xf32> -> vector<8x128xf32>
    %c0_15 = arith.constant 0 : index
    %c0_16 = arith.constant 0 : index
    %23 = vector.load %arg7[%c0_15, %c0_16] : memref<1x128xf32, #tpu.memory_space<vmem>>, vector<1x128xf32>
    %24 = vector.broadcast %23 : vector<1x128xf32> to vector<8x128xf32>
    %25 = arith.addf %22, %24 : vector<8x128xf32>
    %cst_17 = arith.constant 0.000000e+00 : f32
    %26 = vector.broadcast %cst_17 : f32 to vector<8x128xf32>
    %27 = arith.maximumf %25, %26 : vector<8x128xf32>
    %28 = math.tanh %27 : vector<8x128xf32>
    %c0_18 = arith.constant 0 : index
    %c0_19 = arith.constant 0 : index
    %29 = vector.load %arg8[%c0_18, %c0_19] : memref<1x128xf32, #tpu.memory_space<vmem>>, vector<1x128xf32>
    %30 = vector.broadcast %29 : vector<1x128xf32> to vector<8x128xf32>
    %31 = arith.mulf %28, %30 : vector<8x128xf32>
    %c0_20 = arith.constant 0 : index
    %c0_21 = arith.constant 0 : index
    %32 = vector.load %arg9[%c0_20, %c0_21] : memref<1x128xf32, #tpu.memory_space<vmem>>, vector<1x128xf32>
    %33 = vector.broadcast %32 : vector<1x128xf32> to vector<8x128xf32>
    %34 = arith.addf %31, %33 : vector<8x128xf32>
    %c0_22 = arith.constant 0 : index
    %c0_23 = arith.constant 0 : index
    %35 = vector.load %arg10[%c0_22, %c0_23] : memref<8x128xf32, #tpu.memory_space<vmem>>, vector<8x128xf32>
    tpu.vector_store %arg10[%c0_22, %c0_23], %34 {strides = array<i32>} : memref<8x128xf32, #tpu.memory_space<vmem>>, vector<8x128xf32>,
    return
  }
  func.func @transform_0(%arg0: i32) -> (i32, i32) {
    %c0_i32 = arith.constant 0 : i32
    %c0_i32_0 = arith.constant 0 : i32
    return %arg0, %c0_i32 : i32, i32
  }
  func.func @transform_1(%arg0: i32) -> (i32, i32) {
    %c0_i32 = arith.constant 0 : i32
    %c0_i32_0 = arith.constant 0 : i32
    %c0_i32_1 = arith.constant 0 : i32
    return %c0_i32, %c0_i32_0 : i32, i32
  }
  func.func @transform_2(%arg0: i32) -> (i32, i32) {
    %c0_i32 = arith.constant 0 : i32
    %c0_i32_0 = arith.constant 0 : i32
    %c0_i32_1 = arith.constant 0 : i32
    return %c0_i32, %c0_i32_0 : i32, i32
  }
  func.func @transform_3(%arg0: i32) -> (i32, i32) {
    %c0_i32 = arith.constant 0 : i32
    %c0_i32_0 = arith.constant 0 : i32
    %c0_i32_1 = arith.constant 0 : i32
    return %c0_i32, %c0_i32_0 : i32, i32
  }
  func.func @transform_4(%arg0: i32) -> (i32, i32) {
    %c0_i32 = arith.constant 0 : i32
    %c0_i32_0 = arith.constant 0 : i32
    %c0_i32_1 = arith.constant 0 : i32
    return %c0_i32, %c0_i32_0 : i32, i32
  }
  func.func @transform_5(%arg0: i32) -> (i32, i32) {
    %c0_i32 = arith.constant 0 : i32
    %c0_i32_0 = arith.constant 0 : i32
    %c0_i32_1 = arith.constant 0 : i32
    return %c0_i32, %c0_i32_0 : i32, i32
  }
  func.func @transform_6(%arg0: i32) -> (i32, i32) {
    %c0_i32 = arith.constant 0 : i32
    %c0_i32_0 = arith.constant 0 : i32
    %c0_i32_1 = arith.constant 0 : i32
    return %c0_i32, %c0_i32_0 : i32, i32
  }
  func.func @transform_7(%arg0: i32) -> (i32, i32) {
    %c0_i32 = arith.constant 0 : i32
    %c0_i32_0 = arith.constant 0 : i32
    %c0_i32_1 = arith.constant 0 : i32
    return %c0_i32, %c0_i32_0 : i32, i32
  }
  func.func @transform_8(%arg0: i32) -> (i32, i32) {
    %c0_i32 = arith.constant 0 : i32
    %c0_i32_0 = arith.constant 0 : i32
    %c0_i32_1 = arith.constant 0 : i32
    return %c0_i32, %c0_i32_0 : i32, i32
  }
  func.func @transform_9(%arg0: i32) -> (i32, i32) {
    %c0_i32 = arith.constant 0 : i32
    %c0_i32_0 = arith.constant 0 : i32
    return %arg0, %c0_i32 : i32, i32
  }
}

</mosaic_0001>

<bundles_post_ra>
// kernel: tpu_custom_call.1
= control target key start
LH: loop header
LB: loop body
LE: loop exit
PB: predicated region body
PF: predicated region fallthrough
CT: control target
= control target key end

     0   :  { %14 = vsyncpa [#allocation3], 0  ;;  %s899_s0 = inlined_call_operand.hbm [shape: f32[8,32], index: 0, kind: input, shape index: {}]   ;;  %s900_s1 = inlined_call_operand.hbm [shape: f32[32,512], index: 1, kind: input, shape index: {}]   ;;  %s901_s2 = inlined_call_operand.hbm [shape: f32[1,512], index: 2, kind: input, shape index: {}]   ;;  %s902_s3 = inlined_call_operand.hbm [shape: f32[512,256], index: 3, kind: input, shape index: {}]   ;;  %s903_s4 = inlined_call_operand.vmem [shape: f32[1,256], index: 4, kind: input, shape index: {}]   ;;  %s904_s5 = inlined_call_operand.hbm [shape: f32[256,128], index: 5, kind: input, shape index: {}]   ;;  %s905_s6 = inlined_call_operand.vmem [shape: f32[1,128], index: 6, kind: input, shape index: {}]   ;;  %s906_s7 = inlined_call_operand.vmem [shape: f32[1,128], index: 7, kind: input, shape index: {}]   ;;  %s907_s8 = inlined_call_operand.vmem [shape: f32[1,128], index: 8, kind: input, shape index: {}]   ;;  %s908_s9 = inlined_call_operand.hbm [shape: f32[8,128], index: 9, kind: output, shape index: {}]  }
   0x1   :  { %15 = vsyncpa [#allocation6], 0 }
   0x2   :  { %16 = vsyncpa [#allocation9], 0  ;;  %s33_s11 = sshll.u32 %s900_s1, 4  ;;  %s34_s11 = int_to_ptr.hbm [resolvable:$true] %s33_s11 }
   0x3   :  { %17 = vsyncpa [#allocation4], 0  ;;  %s797_s12 = smov [#allocation5]   ;;  %s57_s16 = sshll.u32 %s902_s3, 4  ;;  %s58_s16 = int_to_ptr.hbm [resolvable:$true] %s57_s16 }
   0x4   :  { %s35_s13 = sshll.u32 %s797_s12, 4  ;;  %s798_s17 = smov 512   ;;  %s36_s13 = int_to_ptr.vmem [resolvable:$true] %s35_s13 }
   0x5   :  { %s799_s18 = smov 32   ;;  %s800_s19 = smov [#allocation8]  }
   0x6   :  { %41 = dma.hbm_to_vmem [thread:$0]  %s34_s11, 2048, %s36_s13, [#allocation6], %s798_s17, %s798_s17, %s799_s18  }
   0x7   :  { %s59_s20 = sshll.u32 %s800_s19, 4  ;;  %s801_s21 = smov 256   ;;  %s60_s20 = int_to_ptr.vmem [resolvable:$true] %s59_s20 }
   0x8   :  { %s802_s22 = smov 16   ;;  %s23_s24 = sshll.u32 %s899_s0, 4  ;;  %s24_s24 = int_to_ptr.hbm [resolvable:$true] %s23_s24 }
   0x9   :  { %65 = dma.hbm_to_vmem [thread:$0]  %s58_s16, 16384, %s60_s20, [#allocation9], %s801_s21, %s801_s21, %s802_s22  }
   0xa   :  { %s803_s25 = smov [#allocation2]   ;;  %s47_s28 = sshll.u32 %s901_s2, 4  ;;  %s48_s28 = int_to_ptr.hbm [resolvable:$true] %s47_s28 }
   0xb   :  { %s25_s26 = sshll.u32 %s803_s25, 4  ;;  %s804_s29 = smov [#allocation7]   ;;  %s26_s26 = int_to_ptr.vmem [resolvable:$true] %s25_s26 }
   0xc   :  { %28 = dma.hbm_to_vmem [thread:$0]  %s24_s24, 128, %s26_s26, [#allocation3]  }
   0xd   :  { %s49_s30 = sshll.u32 %s804_s29, 4  ;;  %s72_s12 = sshll.u32 %s904_s5, 4  ;;  %s50_s30 = int_to_ptr.vmem [resolvable:$true] %s49_s30  ;;  %s73_s12 = int_to_ptr.hbm [resolvable:$true] %s72_s12 }
   0xe   :  { %52 = dma.hbm_to_vmem [thread:$0]  %s48_s28, 64, %s50_s30, [#allocation6]  }
   0xf   :  { %s805_s0 = smov [#allocation10]   ;;  %s806_s14 = smov 128  }
  0x10   :  { %s74_s13 = sshll.u32 %s805_s0, 4  ;;  %s807_s15 = smov 8   ;;  %s75_s13 = int_to_ptr.vmem [resolvable:$true] %s74_s13 }
  0x11   :  { %80 = dma.hbm_to_vmem [thread:$0]  %s73_s12, 4096, %s75_s13, [#allocation9], %s806_s14, %s806_s14, %s807_s15  }
  0x12   :  { %789 = dma.done.wait [#allocation3], 128  }
  0x13   :  { %790 = vsyncadd [#allocation3], 4294967168 }
  0x14   :  { %791 = dma.done.wait [#allocation6], 2112  }
  0x15   :  { %792 = vsyncadd [#allocation6], 4294965184 }
  0x16   :  { %793 = dma.done.wait [#allocation9], 20480  }
  0x17   :  { %794 = vsyncadd [#allocation9], 4294946816  ;;  %v118_v0 = vld [vmem:[#allocation5 + $0x40] sm:$0xff]  ;;  %v119_v2 = vld [vmem:[#allocation5 + $0x48] sm:$0xff]  ;;  %vm144_vm0 = vcmask 261120   ;;  %s808_s21 = smov [#allocation11]  }
  0x18   :  { %v122_v1 = vld [vmem:[#allocation5 + $0x60] sm:$0xff]  ;;  %v123_v4 = vld [vmem:[#allocation5 + $0x68] sm:$0xff]  ;;  %v108_v10 = vld [vmem:[#allocation2] sm:$0xff]  ;;  %s610_s22 = sshll.u32 %s808_s21, 4  ;;  %s611_s22 = int_to_ptr.vmem [resolvable:$true] %s610_s22 }
  0x19   :  { %v130_v3 = vpack.c.bf16 %v122_v1, %v118_v0  ;;  %v110_v5 = vld [vmem:[#allocation5] sm:$0xff]  ;;  %v131_v7 = vpack.c.bf16 %v123_v4, %v119_v2  ;;  %v111_v8 = vld [vmem:[#allocation5 + $0x8] sm:$0xff]  ;;  %v120_v12 = vld [vmem:[#allocation5 + $0x50] sm:$0xff]  ;;  %v874_v24 = vpack.c.bf16 %v108_v10, %v108_v10 }
  0x1a   :  { %v114_v6 = vld [vmem:[#allocation5 + $0x20] sm:$0xff]  ;;  %v115_v9 = vld [vmem:[#allocation5 + $0x28] sm:$0xff]  ;;  %v124_v13 = vld [vmem:[#allocation5 + $0x70] sm:$0xff] }
  0x1b   :  { %154 = vmatpush.bf16.msra.mxu2 %v130_v3  ;;  %v126_v11 = vpack.c.bf16 %v114_v6, %v110_v5  ;;  %v121_v14 = vld [vmem:[#allocation5 + $0x58] sm:$0xff]  ;;  %167 = vmatpush.bf16.msra.mxu3 %v131_v7  ;;  %v127_v15 = vpack.c.bf16 %v115_v9, %v111_v8  ;;  %v132_v16 = vpack.c.bf16 %v124_v13, %v120_v12  ;;  %v112_v18 = vld [vmem:[#allocation5 + $0x10] sm:$0xff]  ;;  %v236_v23 = vld [vmem:[#allocation8 + $0xe0] sm:$0xff] }
  0x1c   :  { %v125_v17 = vld [vmem:[#allocation5 + $0x78] sm:$0xff]  ;;  %v116_v19 = vld [vmem:[#allocation5 + $0x30] sm:$0xff]  ;;  %v268_v26 = vld [vmem:[#allocation8 + $0x1e0] sm:$0xff] }
  0x1d   :  { %v133_v20 = vpack.c.bf16 %v125_v17, %v121_v14  ;;  %v113_v21 = vld [vmem:[#allocation5 + $0x18] sm:$0xff]  ;;  %v232_v30 = vld [vmem:[#allocation8 + $0xc0] sm:$0xff]  ;;  %v128_v33 = vpack.c.bf16 %v116_v19, %v112_v18 }
  0x1e   :  { %v117_v22 = vld [vmem:[#allocation5 + $0x38] sm:$0xff]  ;;  %v264_v32 = vld [vmem:[#allocation8 + $0x1c0] sm:$0xff] }
  0x1f   :  { %v238_v25 = vld [vmem:[#allocation8 + $0xf0] sm:$0xff]  ;;  %155 = vmatpush.bf16.msra.mxu2 %v126_v11  ;;  %168 = vmatpush.bf16.msra.mxu3 %v127_v15  ;;  %v129_v35 = vpack.c.bf16 %v117_v22, %v113_v21  ;;  %v228_v38 = vld [vmem:[#allocation8 + $0xa0] sm:$0xff] }
  0x20   :  { %v270_v27 = vld [vmem:[#allocation8 + $0x1f0] sm:$0xff]  ;;  %v350_v28 = vpack.c.bf16 %v238_v25, %v236_v23  ;;  %v260_v40 = vld [vmem:[#allocation8 + $0x1a0] sm:$0xff] }
  0x21   :  { %v366_v29 = vpack.c.bf16 %v270_v27, %v268_v26  ;;  %v234_v31 = vld [vmem:[#allocation8 + $0xd0] sm:$0xff]  ;;  %v300_v42 = vld [vmem:[#allocation8 + $0x2e0] sm:$0xff] }
  0x22   :  { %v266_v34 = vld [vmem:[#allocation8 + $0x1d0] sm:$0xff]  ;;  %406 = vmatpush.bf16.msra.mxu0 %v350_v28  ;;  %v348_v36 = vpack.c.bf16 %v234_v31, %v232_v30  ;;  %624 = vmatmul.msk.bf16.vlgmr.msra.gmra.mxu2 %vm144_vm0, %v874_v24  ;;  %v224_v45 = vld [vmem:[#allocation8 + $0x80] sm:$0xff] }
  0x23   :  { %180 = vmatpush.bf16.msrb.mxu2 %v132_v16  ;;  %193 = vmatpush.bf16.msrb.mxu3 %v133_v20  ;;  %v364_v37 = vpack.c.bf16 %v266_v34, %v264_v32  ;;  %v230_v39 = vld [vmem:[#allocation8 + $0xb0] sm:$0xff]  ;;  %v332_v47 = vld [vmem:[#allocation8 + $0x3e0] sm:$0xff] }
  0x24   :  { %419 = vmatpush.bf16.msra.mxu1 %v366_v29  ;;  %625 = vmatmul.msk.bf16.vlgmr.msra.gmra.mxu3 %vm144_vm0, %v874_v24  ;;  %v262_v41 = vld [vmem:[#allocation8 + $0x1b0] sm:$0xff]  ;;  %v346_v44 = vpack.c.bf16 %v230_v39, %v228_v38  ;;  %v256_v51 = vld [vmem:[#allocation8 + $0x180] sm:$0xff] }
  0x25   :  { %v302_v43 = vld [vmem:[#allocation8 + $0x2f0] sm:$0xff]  ;;  %v362_v49 = vpack.c.bf16 %v262_v41, %v260_v40  ;;  %v296_v54 = vld [vmem:[#allocation8 + $0x2c0] sm:$0xff] }
  0x26   :  { %407 = vmatpush.bf16.msra.mxu0 %v348_v36  ;;  %v382_v46 = vpack.c.bf16 %v302_v43, %v300_v42  ;;  %v334_v48 = vld [vmem:[#allocation8 + $0x3f0] sm:$0xff]  ;;  %v328_v56 = vld [vmem:[#allocation8 + $0x3c0] sm:$0xff]  ;;  %v237_v43 = vld [vmem:[#allocation8 + $0xe8] sm:$0xff] }
  0x27   :  { %181 = vmatpush.bf16.msrb.mxu2 %v128_v33  ;;  %194 = vmatpush.bf16.msrb.mxu3 %v129_v35  ;;  %v226_v50 = vld [vmem:[#allocation8 + $0x90] sm:$0xff]  ;;  %v398_v53 = vpack.c.bf16 %v334_v48, %v332_v47  ;;  %v220_v60 = vld [vmem:[#allocation8 + $0x60] sm:$0xff] }
  0x28   :  { %420 = vmatpush.bf16.msra.mxu1 %v364_v37  ;;  %v258_v52 = vld [vmem:[#allocation8 + $0x190] sm:$0xff]  ;;  %v344_v59 = vpack.c.bf16 %v226_v50, %v224_v45  ;;  %v292_v63 = vld [vmem:[#allocation8 + $0x2a0] sm:$0xff]  ;;  %v269_v45 = vld [vmem:[#allocation8 + $0x1e8] sm:$0xff] }
  0x29   :  { %v298_v55 = vld [vmem:[#allocation8 + $0x2d0] sm:$0xff]  ;;  %v360_v0 = vpack.c.bf16 %v258_v52, %v256_v51  ;;  %v324_v2 = vld [vmem:[#allocation8 + $0x3a0] sm:$0xff]  ;;  %v233_v52 = vld [vmem:[#allocation8 + $0xc8] sm:$0xff] }
  0x2a   :  { %v380_v57 = vpack.c.bf16 %v298_v55, %v296_v54  ;;  %v330_v58 = vld [vmem:[#allocation8 + $0x3d0] sm:$0xff]  ;;  %408 = vmatpush.bf16.msra.mxu0 %v346_v44  ;;  %v252_v4 = vld [vmem:[#allocation8 + $0x160] sm:$0xff]  ;;  %v239_v44 = vld [vmem:[#allocation8 + $0xf8] sm:$0xff] }
  0x2b   :  { %432 = vmatpush.bf16.msra.mxu2 %v382_v46  ;;  %445 = vmatpush.bf16.msra.mxu3 %v398_v53  ;;  %v222_v61 = vld [vmem:[#allocation8 + $0x70] sm:$0xff]  ;;  %v396_v62 = vpack.c.bf16 %v330_v58, %v328_v56  ;;  %v288_v8 = vld [vmem:[#allocation8 + $0x280] sm:$0xff]  ;;  %v271_v46 = vld [vmem:[#allocation8 + $0x1f8] sm:$0xff]  ;;  %v351_v50 = vpack.c.bf16 %v239_v44, %v237_v43 }
  0x2c   :  { %421 = vmatpush.bf16.msra.mxu1 %v362_v49  ;;  %v294_v1 = vld [vmem:[#allocation8 + $0x2b0] sm:$0xff]  ;;  %v342_v10 = vpack.c.bf16 %v222_v61, %v220_v60  ;;  %v320_v11 = vld [vmem:[#allocation8 + $0x380] sm:$0xff]  ;;  %v367_v51 = vpack.c.bf16 %v271_v46, %v269_v45  ;;  %v235_v53 = vld [vmem:[#allocation8 + $0xd8] sm:$0xff] }
  0x2d   :  { %v326_v3 = vld [vmem:[#allocation8 + $0x3b0] sm:$0xff]  ;;  %v378_v6 = vpack.c.bf16 %v294_v1, %v292_v63  ;;  %v216_v14 = vld [vmem:[#allocation8 + $0x40] sm:$0xff]  ;;  %v265_v54 = vld [vmem:[#allocation8 + $0x1c8] sm:$0xff]  ;;  %v349_v56 = vpack.c.bf16 %v235_v53, %v233_v52 }
  0x2e   :  { %v254_v5 = vld [vmem:[#allocation8 + $0x170] sm:$0xff]  ;;  %v394_v7 = vpack.c.bf16 %v326_v3, %v324_v2  ;;  %409 = vmatpush.bf16.msra.mxu0 %v344_v59  ;;  %v248_v16 = vld [vmem:[#allocation8 + $0x140] sm:$0xff]  ;;  %v267_v55 = vld [vmem:[#allocation8 + $0x1d8] sm:$0xff] }
  0x2f   :  { %433 = vmatpush.bf16.msra.mxu2 %v380_v57  ;;  %446 = vmatpush.bf16.msra.mxu3 %v396_v62  ;;  %v290_v9 = vld [vmem:[#allocation8 + $0x290] sm:$0xff]  ;;  %v358_v13 = vpack.c.bf16 %v254_v5, %v252_v4  ;;  %v284_v20 = vld [vmem:[#allocation8 + $0x260] sm:$0xff]  ;;  %v365_v57 = vpack.c.bf16 %v267_v55, %v265_v54  ;;  %v229_v58 = vld [vmem:[#allocation8 + $0xa8] sm:$0xff] }
  0x30   :  { %v322_v12 = vld [vmem:[#allocation8 + $0x390] sm:$0xff]  ;;  %422 = vmatpush.bf16.msra.mxu1 %v360_v0  ;;  %v376_v18 = vpack.c.bf16 %v290_v9, %v288_v8  ;;  %v316_v23 = vld [vmem:[#allocation8 + $0x360] sm:$0xff]  ;;  %v231_v59 = vld [vmem:[#allocation8 + $0xb8] sm:$0xff] }
  0x31   :  { %v218_v15 = vld [vmem:[#allocation8 + $0x50] sm:$0xff]  ;;  %v392_v19 = vpack.c.bf16 %v322_v12, %v320_v11  ;;  %v212_v27 = vld [vmem:[#allocation8 + $0x20] sm:$0xff]  ;;  %v261_v60 = vld [vmem:[#allocation8 + $0x1a8] sm:$0xff]  ;;  %v347_v61 = vpack.c.bf16 %v231_v59, %v229_v58 }
  0x32   :  { %v250_v17 = vld [vmem:[#allocation8 + $0x150] sm:$0xff]  ;;  %410 = vmatpush.bf16.msra.mxu0 %v342_v10  ;;  %v340_v22 = vpack.c.bf16 %v218_v15, %v216_v14  ;;  %626 = vmatmul.msk.bf16.vlgmr.msrb.gmra.mxu2 %vm144_vm0, %v874_v24  ;;  %v244_v29 = vld [vmem:[#allocation8 + $0x120] sm:$0xff]  ;;  %v263_v62 = vld [vmem:[#allocation8 + $0x1b8] sm:$0xff] }
  0x33   :  { %434 = vmatpush.bf16.msra.mxu2 %v378_v6  ;;  %447 = vmatpush.bf16.msra.mxu3 %v394_v7  ;;  %v286_v21 = vld [vmem:[#allocation8 + $0x270] sm:$0xff]  ;;  %v356_v26 = vpack.c.bf16 %v250_v17, %v248_v16  ;;  %v280_v33 = vld [vmem:[#allocation8 + $0x240] sm:$0xff]  ;;  %v363_v63 = vpack.c.bf16 %v263_v62, %v261_v60  ;;  %v225_v5 = vld [vmem:[#allocation8 + $0x88] sm:$0xff] }
  0x34   :  { %v318_v25 = vld [vmem:[#allocation8 + $0x370] sm:$0xff]  ;;  %423 = vmatpush.bf16.msra.mxu1 %v358_v13  ;;  %627 = vmatmul.msk.bf16.vlgmr.msrb.gmra.mxu3 %vm144_vm0, %v874_v24  ;;  %v374_v31 = vpack.c.bf16 %v286_v21, %v284_v20  ;;  %v312_v36 = vld [vmem:[#allocation8 + $0x340] sm:$0xff]  ;;  %v227_v6 = vld [vmem:[#allocation8 + $0x98] sm:$0xff] }
  0x35   :  { %v214_v28 = vld [vmem:[#allocation8 + $0x30] sm:$0xff]  ;;  %v390_v32 = vpack.c.bf16 %v318_v25, %v316_v23  ;;  %v208_v39 = vld [vmem:[#allocation8] sm:$0xff]  ;;  %v345_v8 = vpack.c.bf16 %v227_v6, %v225_v5  ;;  %v257_v9 = vld [vmem:[#allocation8 + $0x188] sm:$0xff] }
  0x36   :  { %v246_v30 = vld [vmem:[#allocation8 + $0x130] sm:$0xff]  ;;  %411 = vmatpush.bf16.msra.mxu0 %v340_v22  ;;  %v338_v35 = vpack.c.bf16 %v214_v28, %v212_v27  ;;  %v240_v41 = vld [vmem:[#allocation8 + $0x100] sm:$0xff]  ;;  %v259_v10 = vld [vmem:[#allocation8 + $0x198] sm:$0xff] }
  0x37   :  { %435 = vmatpush.bf16.msra.mxu2 %v376_v18  ;;  %448 = vmatpush.bf16.msra.mxu3 %v392_v19  ;;  %v282_v34 = vld [vmem:[#allocation8 + $0x250] sm:$0xff]  ;;  %v354_v38 = vpack.c.bf16 %v246_v30, %v244_v29  ;;  %v276_v0 = vld [vmem:[#allocation8 + $0x220] sm:$0xff]  ;;  %v361_v11 = vpack.c.bf16 %v259_v10, %v257_v9  ;;  %v221_v17 = vld [vmem:[#allocation8 + $0x68] sm:$0xff] }
  0x38   :  { %v314_v37 = vld [vmem:[#allocation8 + $0x350] sm:$0xff]  ;;  %424 = vmatpush.bf16.msra.mxu1 %v356_v26  ;;  %v372_v24 = vpack.c.bf16 %v282_v34, %v280_v33  ;;  %v308_v2 = vld [vmem:[#allocation8 + $0x320] sm:$0xff]  ;;  %v223_v18 = vld [vmem:[#allocation8 + $0x78] sm:$0xff] }
  0x39   :  { %v210_v40 = vld [vmem:[#allocation8 + $0x10] sm:$0xff]  ;;  %v388_v47 = vpack.c.bf16 %v314_v37, %v312_v36  ;;  %v272_v12 = vld [vmem:[#allocation8 + $0x200] sm:$0xff]  ;;  %v343_v20 = vpack.c.bf16 %v223_v18, %v221_v17  ;;  %v253_v21 = vld [vmem:[#allocation8 + $0x168] sm:$0xff] }
  0x3a   :  { %v242_v42 = vld [vmem:[#allocation8 + $0x110] sm:$0xff]  ;;  %412 = vmatpush.bf16.msra.mxu0 %v338_v35  ;;  %v336_v48 = vpack.c.bf16 %v210_v40, %v208_v39  ;;  %v304_v14 = vld [vmem:[#allocation8 + $0x300] sm:$0xff]  ;;  %v255_v22 = vld [vmem:[#allocation8 + $0x178] sm:$0xff] }
  0x3b   :  { %436 = vmatpush.bf16.msra.mxu2 %v374_v31  ;;  %449 = vmatpush.bf16.msra.mxu3 %v390_v32  ;;  %v352_v49 = vpack.c.bf16 %v242_v42, %v240_v41  ;;  %v278_v1 = vld [vmem:[#allocation8 + $0x230] sm:$0xff]  ;;  %v301_v23 = vld [vmem:[#allocation8 + $0x2e8] sm:$0xff]  ;;  %v359_v25 = vpack.c.bf16 %v255_v22, %v253_v21  ;;  %v303_v26 = vld [vmem:[#allocation8 + $0x2f8] sm:$0xff] }
  0x3c   :  { %425 = vmatpush.bf16.msra.mxu1 %v354_v38  ;;  %v370_v3 = vpack.c.bf16 %v278_v1, %v276_v0  ;;  %v310_v4 = vld [vmem:[#allocation8 + $0x330] sm:$0xff]  ;;  %v333_v27 = vld [vmem:[#allocation8 + $0x3e8] sm:$0xff]  ;;  %v335_v28 = vld [vmem:[#allocation8 + $0x3f8] sm:$0xff]  ;;  %v383_v29 = vpack.c.bf16 %v303_v26, %v301_v23 }
  0x3d   :  { %v386_v7 = vpack.c.bf16 %v310_v4, %v308_v2  ;;  %v274_v13 = vld [vmem:[#allocation8 + $0x210] sm:$0xff]  ;;  %v399_v30 = vpack.c.bf16 %v335_v28, %v333_v27  ;;  %v217_v31 = vld [vmem:[#allocation8 + $0x48] sm:$0xff]  ;;  %v219_v32 = vld [vmem:[#allocation8 + $0x58] sm:$0xff] }
  0x3e   :  { %413 = vmatpush.bf16.msra.mxu0 %v336_v48  ;;  %v368_v15 = vpack.c.bf16 %v274_v13, %v272_v12  ;;  %v306_v16 = vld [vmem:[#allocation8 + $0x310] sm:$0xff]  ;;  %v249_v33 = vld [vmem:[#allocation8 + $0x148] sm:$0xff]  ;;  %v341_v34 = vpack.c.bf16 %v219_v32, %v217_v31  ;;  %v251_v35 = vld [vmem:[#allocation8 + $0x158] sm:$0xff] }
  0x3f   :  { %437 = vmatpush.bf16.msra.mxu2 %v372_v24  ;;  %450 = vmatpush.bf16.msra.mxu3 %v388_v47  ;;  %v384_v19 = vpack.c.bf16 %v306_v16, %v304_v14  ;;  %v297_v36 = vld [vmem:[#allocation8 + $0x2c8] sm:$0xff]  ;;  %v299_v37 = vld [vmem:[#allocation8 + $0x2d8] sm:$0xff]  ;;  %v357_v38 = vpack.c.bf16 %v251_v35, %v249_v33 }
  0x40   :  { %426 = vmatpush.bf16.msra.mxu1 %v352_v49  ;;  %v381_v39 = vpack.c.bf16 %v299_v37, %v297_v36  ;;  %v329_v40 = vld [vmem:[#allocation8 + $0x3c8] sm:$0xff]  ;;  %v331_v41 = vld [vmem:[#allocation8 + $0x3d8] sm:$0xff] }
  0x41   :  { %v397_v42 = vpack.c.bf16 %v331_v41, %v329_v40  ;;  %v213_v43 = vld [vmem:[#allocation8 + $0x28] sm:$0xff]  ;;  %v215_v44 = vld [vmem:[#allocation8 + $0x38] sm:$0xff] }
  0x42   :  { %458 = vmatpush.bf16.msrb.mxu0 %v351_v50  ;;  %v245_v24 = vld [vmem:[#allocation8 + $0x128] sm:$0xff]  ;;  %v339_v45 = vpack.c.bf16 %v215_v44, %v213_v43  ;;  %v247_v46 = vld [vmem:[#allocation8 + $0x138] sm:$0xff] }
  0x43   :  { %438 = vmatpush.bf16.msra.mxu2 %v370_v3  ;;  %451 = vmatpush.bf16.msra.mxu3 %v386_v7  ;;  %v293_v47 = vld [vmem:[#allocation8 + $0x2a8] sm:$0xff]  ;;  %v295_v48 = vld [vmem:[#allocation8 + $0x2b8] sm:$0xff]  ;;  %v355_v49 = vpack.c.bf16 %v247_v46, %v245_v24 }
  0x44   :  { %471 = vmatpush.bf16.msrb.mxu1 %v367_v51  ;;  %v379_v50 = vpack.c.bf16 %v295_v48, %v293_v47  ;;  %v325_v51 = vld [vmem:[#allocation8 + $0x3a8] sm:$0xff]  ;;  %v327_v52 = vld [vmem:[#allocation8 + $0x3b8] sm:$0xff] }
  0x45   :  { %v395_v53 = vpack.c.bf16 %v327_v52, %v325_v51  ;;  %v209_v54 = vld [vmem:[#allocation8 + $0x8] sm:$0xff]  ;;  %v211_v55 = vld [vmem:[#allocation8 + $0x18] sm:$0xff]  ;;  %v528_v51 = vld [vmem:[#allocation10 + $0x70] sm:$0xff] }
  0x46   :  { %459 = vmatpush.bf16.msrb.mxu0 %v349_v56  ;;  %v241_v56 = vld [vmem:[#allocation8 + $0x108] sm:$0xff]  ;;  %v243_v58 = vld [vmem:[#allocation8 + $0x118] sm:$0xff] }
  0x47   :  { %439 = vmatpush.bf16.msra.mxu2 %v368_v15  ;;  %452 = vmatpush.bf16.msra.mxu3 %v384_v19  ;;  %v289_v59 = vld [vmem:[#allocation8 + $0x288] sm:$0xff]  ;;  %v291_v60 = vld [vmem:[#allocation8 + $0x298] sm:$0xff] }
  0x48   :  { %472 = vmatpush.bf16.msrb.mxu1 %v365_v57  ;;  %v337_v57 = vpack.c.bf16 %v211_v55, %v209_v54  ;;  %v377_v62 = vpack.c.bf16 %v291_v60, %v289_v59  ;;  %v323_v0 = vld [vmem:[#allocation8 + $0x398] sm:$0xff]  ;;  %v285_v2 = vld [vmem:[#allocation8 + $0x268] sm:$0xff]  ;;  %v526_v54 = vld [vmem:[#allocation10 + $0x60] sm:$0xff] }
  0x49   :  { %v287_v3 = vld [vmem:[#allocation8 + $0x278] sm:$0xff]  ;;  %v317_v4 = vld [vmem:[#allocation8 + $0x368] sm:$0xff]  ;;  %v522_v60 = vld [vmem:[#allocation10 + $0x40] sm:$0xff] }
  0x4a   :  { %460 = vmatpush.bf16.msrb.mxu0 %v347_v61  ;;  %v353_v61 = vpack.c.bf16 %v243_v58, %v241_v56  ;;  %v375_v5 = vpack.c.bf16 %v287_v3, %v285_v2  ;;  %v319_v6 = vld [vmem:[#allocation8 + $0x378] sm:$0xff]  ;;  %v313_v10 = vld [vmem:[#allocation8 + $0x348] sm:$0xff] }
  0x4b   :  { %484 = vmatpush.bf16.msrb.mxu2 %v383_v29  ;;  %497 = vmatpush.bf16.msrb.mxu3 %v399_v30  ;;  %v391_v7 = vpack.c.bf16 %v319_v6, %v317_v4  ;;  %v283_v9 = vld [vmem:[#allocation8 + $0x258] sm:$0xff]  ;;  %v277_v15 = vld [vmem:[#allocation8 + $0x228] sm:$0xff] }
  0x4c   :  { %473 = vmatpush.bf16.msrb.mxu1 %v363_v63  ;;  %v321_v63 = vld [vmem:[#allocation8 + $0x388] sm:$0xff]  ;;  %v315_v12 = vld [vmem:[#allocation8 + $0x358] sm:$0xff] }
  0x4d   :  { %v393_v1 = vpack.c.bf16 %v323_v0, %v321_v63  ;;  %v389_v14 = vpack.c.bf16 %v315_v12, %v313_v10  ;;  %v279_v16 = vld [vmem:[#allocation8 + $0x238] sm:$0xff]  ;;  %v309_v17 = vld [vmem:[#allocation8 + $0x328] sm:$0xff]  ;;  %v520_v63 = vld [vmem:[#allocation10 + $0x30] sm:$0xff] }
  0x4e   :  { %461 = vmatpush.bf16.msrb.mxu0 %v345_v8  ;;  %v281_v8 = vld [vmem:[#allocation8 + $0x248] sm:$0xff]  ;;  %v311_v18 = vld [vmem:[#allocation8 + $0x338] sm:$0xff]  ;;  %v371_v21 = vpack.c.bf16 %v279_v16, %v277_v15 }
  0x4f   :  { %485 = vmatpush.bf16.msrb.mxu2 %v381_v39  ;;  %498 = vmatpush.bf16.msrb.mxu3 %v397_v42  ;;  %v373_v13 = vpack.c.bf16 %v283_v9, %v281_v8  ;;  %v387_v22 = vpack.c.bf16 %v311_v18, %v309_v17  ;;  %v275_v26 = vld [vmem:[#allocation8 + $0x218] sm:$0xff]  ;;  %v305_v29 = vld [vmem:[#allocation8 + $0x308] sm:$0xff]  ;;  %v514_v17 = vld [vmem:[#allocation10] sm:$0xff] }
  0x50   :  { %474 = vmatpush.bf16.msrb.mxu1 %v361_v11  ;;  %v134_v11 = vld [vmem:[#allocation7] sm:$0xf]  ;;  %v527_v55 = vld [vmem:[#allocation10 + $0x68] sm:$0xff] }
  0x51   :  { %v136_v19 = vperm.slane %v134_v11, 0  ;;  %v307_v30 = vld [vmem:[#allocation8 + $0x318] sm:$0xff]  ;;  %v138_v40 = vperm.slane %v134_v11, 2  ;;  %v139_v41 = vperm.slane %v134_v11, 3  ;;  %v552_v56 = vpack.c.bf16 %v527_v55, %v526_v54  ;;  %v519_v6 = vld [vmem:[#allocation10 + $0x28] sm:$0xff] }
  0x52   :  { %462 = vmatpush.bf16.msrb.mxu0 %v343_v20  ;;  %v137_v20 = vperm.slane %v134_v11, 1  ;;  %v385_v35 = vpack.c.bf16 %v307_v30, %v305_v29  ;;  %v529_v52 = vld [vmem:[#allocation10 + $0x78] sm:$0xff]  ;;  %v543_v9 = vld [vmem:[#allocation10 + $0xe8] sm:$0xff]  ;;  %v516_v11 = vld [vmem:[#allocation10 + $0x10] sm:$0xff] }
  0x53   :  { %486 = vmatpush.bf16.msrb.mxu2 %v379_v50  ;;  %499 = vmatpush.bf16.msrb.mxu3 %v395_v53  ;;  %v553_v53 = vpack.c.bf16 %v529_v52, %v528_v51  ;;  %v525_v58 = vld [vmem:[#allocation10 + $0x58] sm:$0xff]  ;;  %v515_v18 = vld [vmem:[#allocation10 + $0x8] sm:$0xff] }
  0x54   :  { %475 = vmatpush.bf16.msrb.mxu1 %v359_v25  ;;  %v273_v25 = vld [vmem:[#allocation8 + $0x208] sm:$0xff]  ;;  %v521_v0 = vld [vmem:[#allocation10 + $0x38] sm:$0xff] }
  0x55   :  { %v369_v33 = vpack.c.bf16 %v275_v26, %v273_v25  ;;  %v549_v2 = vpack.c.bf16 %v521_v0, %v520_v63  ;;  %v545_v3 = vld [vmem:[#allocation10 + $0xf8] sm:$0xff] }
  0x56   :  { %463 = vmatpush.bf16.msrb.mxu0 %v341_v34  ;;  %v517_v12 = vld [vmem:[#allocation10 + $0x18] sm:$0xff] }
  0x57   :  { %487 = vmatpush.bf16.msrb.mxu2 %v377_v62  ;;  %500 = vmatpush.bf16.msrb.mxu3 %v393_v1  ;;  %v544_v1 = vld [vmem:[#allocation10 + $0xf0] sm:$0xff]  ;;  %v541_v15 = vld [vmem:[#allocation10 + $0xd8] sm:$0xff] }
  0x58   :  { %476 = vmatpush.bf16.msrb.mxu1 %v357_v38  ;;  %v561_v4 = vpack.c.bf16 %v545_v3, %v544_v1  ;;  %v537_v25 = vld [vmem:[#allocation10 + $0xb8] sm:$0xff] }
  0x5a   :  { %464 = vmatpush.bf16.msrb.mxu0 %v339_v45 }
  0x5b   :  { %488 = vmatpush.bf16.msrb.mxu2 %v375_v5  ;;  %501 = vmatpush.bf16.msrb.mxu3 %v391_v7  ;;  %v518_v5 = vld [vmem:[#allocation10 + $0x20] sm:$0xff] }
  0x5c   :  { %477 = vmatpush.bf16.msrb.mxu1 %v355_v49  ;;  %v542_v7 = vld [vmem:[#allocation10 + $0xe0] sm:$0xff]  ;;  %v548_v8 = vpack.c.bf16 %v519_v6, %v518_v5 }
  0x5d   :  { %v560_v10 = vpack.c.bf16 %v543_v9, %v542_v7 }
  0x5e   :  { %465 = vmatpush.bf16.msrb.mxu0 %v337_v57  ;;  %v524_v57 = vld [vmem:[#allocation10 + $0x50] sm:$0xff] }
  0x5f   :  { %489 = vmatpush.bf16.msrb.mxu2 %v373_v13  ;;  %502 = vmatpush.bf16.msrb.mxu3 %v389_v14  ;;  %v551_v59 = vpack.c.bf16 %v525_v58, %v524_v57  ;;  %v540_v13 = vld [vmem:[#allocation10 + $0xd0] sm:$0xff]  ;;  %v547_v14 = vpack.c.bf16 %v517_v12, %v516_v11 }
  0x60   :  { %478 = vmatpush.bf16.msrb.mxu1 %v353_v61  ;;  %v523_v61 = vld [vmem:[#allocation10 + $0x48] sm:$0xff]  ;;  %v559_v16 = vpack.c.bf16 %v541_v15, %v540_v13  ;;  %v642_v11 = vld [vmem:[%s907_s8] ss:$0 sm:$0xff] }
  0x61   :  { %v550_v62 = vpack.c.bf16 %v523_v61, %v522_v60 }
  0x63   :  { %490 = vmatpush.bf16.msrb.mxu2 %v371_v21  ;;  %503 = vmatpush.bf16.msrb.mxu3 %v387_v22  ;;  %v539_v21 = vld [vmem:[#allocation10 + $0xc8] sm:$0xff] }
  0x67   :  { %491 = vmatpush.bf16.msrb.mxu2 %v369_v33  ;;  %504 = vmatpush.bf16.msrb.mxu3 %v385_v35  ;;  %v533_v33 = vld [vmem:[#allocation10 + $0x98] sm:$0xff] }
  0xa5   :  { %v157_v23 = vpop.f32.mrf.mxu2 }
  0xa6   :  { %v158_v27 = vadd.f32 %v157_v23, %v136_v19  ;;  %v538_v19 = vld [vmem:[#allocation10 + $0xc0] sm:$0xff]  ;;  %v536_v23 = vld [vmem:[#allocation10 + $0xb0] sm:$0xff] }
  0xa7   :  { %v170_v28 = vpop.f32.mrf.mxu3  ;;  %v558_v22 = vpack.c.bf16 %v539_v21, %v538_v19  ;;  %v557_v26 = vpack.c.bf16 %v537_v25, %v536_v23 }
  0xa8   :  { %v171_v31 = vadd.f32 %v170_v28, %v137_v20  ;;  %v200_v32 = vmax.f32 %v158_v27, 0.0  ;;  %v546_v20 = vpack.c.bf16 %v515_v18, %v514_v17  ;;  %v534_v27 = vld [vmem:[#allocation10 + $0xa0] sm:$0xff]  ;;  %v535_v28 = vld [vmem:[#allocation10 + $0xa8] sm:$0xff] }
  0xaa   :  { %v201_v34 = vmax.f32 %v171_v31, 0.0  ;;  %v204_v36 = vpack.c.bf16 %v200_v32, %v200_v32  ;;  %v556_v31 = vpack.c.bf16 %v535_v28, %v534_v27  ;;  %v532_v32 = vld [vmem:[#allocation10 + $0x90] sm:$0xff] }
  0xac   :  { %v205_v37 = vpack.c.bf16 %v201_v34, %v201_v34  ;;  %414 = vmatmul.bf16.vlgmr.msra.gmra.mxu0 %v204_v36  ;;  %v555_v34 = vpack.c.bf16 %v533_v33, %v532_v32 }
  0xad   :  { %v159_v38 = vpop.f32.mrf.mxu2  ;;  %566 = vmatpush.bf16.msra.mxu0 %v553_v53 }
  0xae   :  { %427 = vmatmul.bf16.vlgmr.msra.gmra.mxu1 %v205_v37  ;;  %v530_v38 = vld [vmem:[#allocation10 + $0x80] sm:$0xff] }
  0xaf   :  { %v172_v39 = vpop.f32.mrf.mxu3  ;;  %579 = vmatpush.bf16.msra.mxu1 %v561_v4  ;;  %v640_v4 = vld [vmem:[%s905_s6] ss:$0 sm:$0xff]  ;;  %s612_s6 = sshll.u32 %s908_s9, 4  ;;  %s613_s6 = int_to_ptr.hbm [resolvable:$true] %s612_s6 }
  0xb0   :  { %v531_v39 = vld [vmem:[#allocation10 + $0x88] sm:$0xff] }
  0xb1   :  { %567 = vmatpush.bf16.msra.mxu0 %v552_v56 }
  0xb3   :  { %580 = vmatpush.bf16.msra.mxu1 %v560_v10  ;;  %v641_v10 = vld [vmem:[%s906_s7] ss:$0 sm:$0xff] }
  0xb5   :  { %v183_v42 = vpop.f32.mrf.mxu2  ;;  %568 = vmatpush.bf16.msra.mxu0 %v551_v59 }
  0xb6   :  { %v184_v43 = vadd.f32 %v183_v42, %v138_v40  ;;  %v554_v40 = vpack.c.bf16 %v531_v39, %v530_v38 }
  0xb7   :  { %v196_v44 = vpop.f32.mrf.mxu3  ;;  %581 = vmatpush.bf16.msra.mxu1 %v559_v16 }
  0xb8   :  { %v197_v24 = vadd.f32 %v196_v44, %v139_v41  ;;  %v202_v45 = vmax.f32 %v184_v43, 0.0 }
  0xb9   :  { %569 = vmatpush.bf16.msra.mxu0 %v550_v62 }
  0xba   :  { %v203_v46 = vmax.f32 %v197_v24, 0.0  ;;  %v206_v47 = vpack.c.bf16 %v202_v45, %v202_v45 }
  0xbb   :  { %582 = vmatpush.bf16.msra.mxu1 %v558_v22 }
  0xbc   :  { %v207_v48 = vpack.c.bf16 %v203_v46, %v203_v46  ;;  %440 = vmatmul.bf16.vlgmr.msra.gmra.mxu2 %v206_v47  ;;  %466 = vmatmul.bf16.vlgmr.msrb.gmra.mxu0 %v204_v36 }
  0xbd   :  { %v185_v49 = vpop.f32.mrf.mxu2  ;;  %570 = vmatpush.bf16.msra.mxu0 %v549_v2 }
  0xbe   :  { %453 = vmatmul.bf16.vlgmr.msra.gmra.mxu3 %v207_v48  ;;  %479 = vmatmul.bf16.vlgmr.msrb.gmra.mxu1 %v205_v37  ;;  %v400_v37 = vld [vmem:[%s903_s4] sm:$0x3] }
  0xbf   :  { %v198_v50 = vpop.f32.mrf.mxu3  ;;  %583 = vmatpush.bf16.msra.mxu1 %v557_v26  ;;  %v402_v41 = vperm.slane %v400_v37, 0  ;;  %v403_v52 = vperm.slane %v400_v37, 1 }
  0xc1   :  { %571 = vmatpush.bf16.msra.mxu0 %v548_v8 }
  0xc3   :  { %584 = vmatpush.bf16.msra.mxu1 %v556_v31 }
  0xc5   :  { %572 = vmatpush.bf16.msra.mxu0 %v547_v14 }
  0xc7   :  { %585 = vmatpush.bf16.msra.mxu1 %v555_v34 }
  0xc9   :  { %573 = vmatpush.bf16.msra.mxu0 %v546_v20 }
  0xcb   :  { %586 = vmatpush.bf16.msra.mxu1 %v554_v40 }
  0xcc   :  { %492 = vmatmul.bf16.vlgmr.msrb.gmra.mxu2 %v206_v47 }
  0xce   :  { %505 = vmatmul.bf16.vlgmr.msrb.gmra.mxu3 %v207_v48 }
 0x129   :  { %v415_v29 = vpop.f32.mrf.mxu0 }
 0x12a   :  { %v416_v43 = vadd.f32 %v415_v29, %v402_v41 }
 0x12b   :  { %v428_v30 = vpop.f32.mrf.mxu1 }
 0x12c   :  { %v429_v24 = vadd.f32 %v428_v30, %v416_v43 }
 0x131   :  { %v417_v35 = vpop.f32.mrf.mxu0 }
 0x133   :  { %v430_v36 = vpop.f32.mrf.mxu1 }
 0x139   :  { %v467_v42 = vpop.f32.mrf.mxu0 }
 0x13a   :  { %v468_v56 = vadd.f32 %v467_v42, %v403_v52 }
 0x13b   :  { %v480_v44 = vpop.f32.mrf.mxu1 }
 0x13c   :  { %v481_v57 = vadd.f32 %v480_v44, %v468_v56 }
 0x13f   :  { %v441_v45 = vpop.f32.mrf.mxu2 }
 0x140   :  { %v442_v46 = vadd.f32 %v441_v45, %v429_v24 }
 0x141   :  { %v454_v47 = vpop.f32.mrf.mxu3  ;;  %v469_v48 = vpop.f32.mrf.mxu0 }
 0x142   :  { %v455_v49 = vadd.f32 %v454_v47, %v442_v46 }
 0x143   :  { %v482_v50 = vpop.f32.mrf.mxu1 }
 0x144   :  { %v510_v51 = vmax.f32 %v455_v49, 0.0 }
 0x146   :  { %v512_v53 = vpack.c.bf16 %v510_v51, %v510_v51 }
 0x147   :  { %v443_v54 = vpop.f32.mrf.mxu2 }
 0x148   :  { %574 = vmatmul.bf16.vlgmr.msra.gmra.mxu0 %v512_v53 }
 0x149   :  { %v456_v55 = vpop.f32.mrf.mxu3 }
 0x14f   :  { %v493_v58 = vpop.f32.mrf.mxu2 }
 0x150   :  { %v494_v59 = vadd.f32 %v493_v58, %v481_v57 }
 0x151   :  { %v506_v60 = vpop.f32.mrf.mxu3 }
 0x152   :  { %v507_v61 = vadd.f32 %v506_v60, %v494_v59 }
 0x154   :  { %v511_v62 = vmax.f32 %v507_v61, 0.0 }
 0x156   :  { %v513_v63 = vpack.c.bf16 %v511_v62, %v511_v62 }
 0x157   :  { %v495_v0 = vpop.f32.mrf.mxu2 }
 0x158   :  { %587 = vmatmul.bf16.vlgmr.msra.gmra.mxu1 %v513_v63 }
 0x159   :  { %v508_v1 = vpop.f32.mrf.mxu3 }
 0x1c5   :  { %v575_v2 = vpop.f32.mrf.mxu0 }
 0x1c6   :  { %v576_v5 = vadd.f32 %v640_v4, %v575_v2 }
 0x1cd   :  { %v577_v3 = vpop.f32.mrf.mxu0 }
 0x1d5   :  { %v588_v6 = vpop.f32.mrf.mxu1 }
 0x1d6   :  { %v589_v7 = vadd.f32 %v588_v6, %v576_v5 }
 0x1d8   :  { %v592_v8 = vmax.f32 %v589_v7, 0.0 }
 0x1da   :  { %643 = vtanh.f32 %v592_v8 }
 0x1dd   :  { %v590_v9 = vpop.f32.mrf.mxu1 }
 0x1e0   :  { %v644_v12 = vpop.eup %643 }
 0x1e1   :  { %v598_v13 = vmul.f32 %v644_v12, %v641_v10 }
 0x1e3   :  { %v603_v14 = vadd.f32 %v642_v11, %v598_v13 }
 0x1e5   :  { %604 = vst [vmem:[#allocation11] sm:$0xff] %v603_v14 }
 0x1e6   :  { %615 = dma.vmem_to_hbm [thread:$0]  %s611_s22, 128, %s613_s6, [#allocation4]  }
 0x1e7   :  { %795 = dma.done.wait [#allocation4], 128  }
 0x1e8   :  { %796 = vsyncadd [#allocation4], 4294967168 }
 0x1e9   :  { %620 = vsyncpa [#allocation3], 1 }
 0x1ea   :  { %621 = vsyncpa [#allocation6], 1 }
 0x1eb   :  { %622 = vsyncpa [#allocation9], 1 }
 0x1ec   :  { %623 = vsyncpa [#allocation4], 1 }

</bundles_post_ra>
